<compile_context>
chip_gen: v5e
topology: v5e:2x2
jax: 0.10.0
libtpu: 0.0.40
codegen_flags: <defaults>
</compile_context>

<pallas_src>
import jax
import jax.numpy as jnp
from jax.experimental import pallas as pl
from jax.experimental.pallas import tpu as pltpu


def _silu(y):
    # exp on the EUP; approximate reciprocal also uses the EUP slot (~1e-3 rel
    # err) instead of a VPU divide.  Inputs/outputs stay f32.
    return y * pl.reciprocal(1.0 + jnp.exp(-y), approx=True)


def _make_bottleneck_kernel(add, rows, img_h, vertical):
    """rows = NB*H rows per block; img_h = H (per-image row count)."""
    M, H = rows, img_h

    def kernel(x_ref, w1_ref, b1_ref, w2_ref, b2_ref, o_ref):
        x_blk = x_ref[...]                                     # (M, W*C1)

        # ---- cv1: 1x1 conv (BN scale folded into w1) + bias + SiLU ----
        y1 = jnp.dot(x_blk.astype(w1_ref.dtype), w1_ref[...],
                     preferred_element_type=jnp.float32)       # (M, W*Cm)
        y1 = _silu(y1 + b1_ref[...])                           # f32 epilogue

        # ---- vertical 3x3 taps: rows h-1 / h+1, zero rows at image borders ----
        if vertical == "roll":
            row = jax.lax.broadcasted_iota(jnp.int32, (M, 1), 0)
            top = (row % H) == 0
            bot = (row % H) == (H - 1)
            prev_r = jnp.where(top, 0.0, pltpu.roll(y1, shift=1, axis=0))
            next_r = jnp.where(bot, 0.0, pltpu.roll(y1, shift=M - 1, axis=0))
        else:
            # Fallback: exact permutation matrices built in-kernel from iota
            # (no DMA'd operand); two small extra MXU pushes.
            r = jax.lax.broadcasted_iota(jnp.int32, (M, M), 0)
            c = jax.lax.broadcasted_iota(jnp.int32, (M, M), 1)
            p_prev = ((c == r - 1) & (r % H != 0)).astype(jnp.float32)
            p_next = ((c == r + 1) & (r % H != H - 1)).astype(jnp.float32)
            prev_r = jnp.dot(p_prev, y1, preferred_element_type=jnp.float32)
            next_r = jnp.dot(p_next, y1, preferred_element_type=jnp.float32)

        # ---- cv2: three accumulating K=W*Cm dots against banded weights ----
        wd = w2_ref.dtype
        y2 = jnp.dot(prev_r.astype(wd), w2_ref[0],
                     preferred_element_type=jnp.float32)
        y2 = y2 + jnp.dot(y1.astype(wd), w2_ref[1],
                          preferred_element_type=jnp.float32)
        y2 = y2 + jnp.dot(next_r.astype(wd), w2_ref[2],
                          preferred_element_type=jnp.float32)
        y2 = _silu(y2 + b2_ref[...])

        if add:                                                # residual (C1 == C2)
            y2 = y2 + x_blk.astype(jnp.float32)
        o_ref[...] = y2.astype(o_ref.dtype)

    return kernel


def _pick_batch_block(N, H, target_rows=256):
    """Largest NB dividing N with tile-aligned NB*H <= target, keeping >=2 steps."""
    cands = [nb for nb in range(1, N + 1)
             if N % nb == 0 and ((nb * H) % 8 == 0 or nb == N)]
    if not cands:
        return N
    small = [nb for nb in cands if nb * H <= target_rows]
    pool = small if small else [min(cands)]
    multi = [nb for nb in pool if N // nb >= 2]
    pool = multi if multi else pool
    return max(pool)


def bottleneck_pallas(x, w1, sb1, w2, sb2, *, shortcut=True,
                      mxu_dtype=jnp.bfloat16, batch_block=None,
                      vertical="auto"):
    """Bottleneck forward.

    x   : (N, H, W, C1) NHWC activations.
    w1  : (C1, Cm)        cv1 1x1 conv weight (HWIO with H=W=1 squeezed).
    sb1 : (2, Cm)         cv1 folded BN (row 0 = scale, row 1 = bias).
    w2  : (3, 3, Cm, C2)  cv2 3x3 conv weight (HWIO).
    sb2 : (2, C2)         cv2 folded BN.
    Returns (N, H, W, C2).
    """
    N, H, W, C1 = x.shape
    Cm = w1.shape[1]
    C2 = w2.shape[-1]
    add = shortcut and (C1 == C2)
    f32 = jnp.float32

    NB = batch_block if batch_block is not None else _pick_batch_block(N, H)
    assert N % NB == 0
    M = NB * H                                           # rows per grid step

    # Lane-dense layout: fold W into lanes, merge (N, H) into rows.
    x_d = x.reshape(N * H, W * C1)

    # ---- fold BN scale + spatial structure into the weights (wrapper-side) ----
    s1, b1 = sb1[0].astype(f32), sb1[1].astype(f32)
    s2, b2 = sb2[0].astype(f32), sb2[1].astype(f32)

    # cv1: block-diagonal (W*C1, W*Cm), BN scale folded along output channels.
    w1_big = jnp.kron(jnp.eye(W, dtype=f32),
                      w1.astype(f32) * s1[None, :]).astype(mxu_dtype)
    # cv2: per-dy banded weights (W*Cm, W*C2); bands carry the horizontal taps
    # including the left/right SAME zero padding, plus the BN scale.
    bands = []
    for dy in range(3):
        band = jnp.zeros((W * Cm, W * C2), f32)
        for ox in (-1, 0, 1):
            band = band + jnp.kron(jnp.eye(W, k=-ox, dtype=f32),
                                   w2[dy, ox + 1].astype(f32) * s2[None, :])
        bands.append(band)
    w2_bands = jnp.stack(bands, axis=0).astype(mxu_dtype)    # (3, W*Cm, W*C2)

    # Guard the O(W^2*C^2) fold against VMEM (v7x has 64 MiB total, 32 scoped).
    folded_bytes = (w1_big.size + w2_bands.size) * jnp.dtype(mxu_dtype).itemsize
    if folded_bytes > 24 * 1024 * 1024:
        # TODO(synk): switch to channels-on-lanes layout / W tiling at this scale.
        raise ValueError(
            f"folded Bottleneck weights ({folded_bytes} bytes) exceed the VMEM "
            "budget; this kron-folded kernel only targets small W*C shapes")

    # Only the bias remains as a per-lane epilogue operand.
    b1_d = jnp.tile(b1, (W,)).reshape(1, W * Cm)
    b2_d = jnp.tile(b2, (W,)).reshape(1, W * C2)

    def run(vert):
        kernel = _make_bottleneck_kernel(add, M, H, vert)
        return pl.pallas_call(
            kernel,
            out_shape=jax.ShapeDtypeStruct((N * H, W * C2), x.dtype),
            grid_spec=pltpu.PrefetchScalarGridSpec(
                num_scalar_prefetch=0,
                grid=(N // NB,),
                in_specs=[
                    pl.BlockSpec((M, W * C1), lambda i: (i, 0)),
                    pl.BlockSpec(w1_big.shape, lambda i: (0, 0)),
                    pl.BlockSpec(b1_d.shape, lambda i: (0, 0)),
                    pl.BlockSpec(w2_bands.shape, lambda i: (0, 0, 0)),
                    pl.BlockSpec(b2_d.shape, lambda i: (0, 0)),
                ],
                out_specs=pl.BlockSpec((M, W * C2), lambda i: (i, 0)),
            ),
            compiler_params=pltpu.CompilerParams(
                dimension_semantics=("parallel",)),
        )(x_d, w1_big, b1_d, w2_bands, b2_d)

    if vertical == "auto":
        try:
            out_d = run("roll")
        except Exception:
            # Sublane roll did not lower for this shape/generation: fall back to
            # the in-kernel permutation-matmul variant (numerically identical
            # up to the order of f32 accumulation).
            out_d = run("matmul")
    else:
        out_d = run(vertical)

    return out_d.reshape(N, H, W, C2)


def bottleneck_ref(x, w1, sb1, w2, sb2, *, shortcut=True):
    """Pure-JAX reference (lax convs, NHWC / HWIO)."""
    C1 = x.shape[-1]
    C2 = w2.shape[-1]
    dn = ("NHWC", "HWIO", "NHWC")
    y1 = jax.lax.conv_general_dilated(
        x.astype(jnp.float32), w1[None, None, :, :], (1, 1), "SAME",
        dimension_numbers=dn)
    y1 = y1 * sb1[0] + sb1[1]
    y1 = y1 * jax.nn.sigmoid(y1)
    y2 = jax.lax.conv_general_dilated(
        y1, w2, (1, 1), "SAME", dimension_numbers=dn)
    y2 = y2 * sb2[0] + sb2[1]
    y2 = y2 * jax.nn.sigmoid(y2)
    if shortcut and C1 == C2:
        y2 = y2 + x.astype(jnp.float32)
    return y2


if __name__ == "__main__":
    # Bottleneck(c1=8, c2=8, shortcut=True, g=1, e=0.5)  -> c_ = 4
    N, H, W = 4, 16, 16
    C1, C2 = 8, 8
    E = 0.5
    Cm = int(C2 * E)
    EPS = 1e-5

    key = jax.random.PRNGKey(0)
    k = jax.random.split(key, 10)

    x = jax.random.normal(k[0], (N, H, W, C1), jnp.float32)

    # cv1: 1x1 conv weight (HWIO squeezed -> (C1, Cm)), folded BN params
    w1 = jax.random.normal(k[1], (C1, Cm), jnp.float32) * 0.2
    g1 = jax.random.uniform(k[2], (Cm,), jnp.float32, 0.8, 1.2)
    b1 = jax.random.normal(k[3], (Cm,), jnp.float32) * 0.1
    m1 = jax.random.normal(k[4], (Cm,), jnp.float32) * 0.1
    v1 = jax.random.uniform(k[5], (Cm,), jnp.float32, 0.5, 1.5)
    s1 = g1 / jnp.sqrt(v1 + EPS)
    sb1 = jnp.stack([s1, b1 - m1 * s1], axis=0)             # (2, Cm)

    # cv2: 3x3 conv weight (HWIO -> (3, 3, Cm, C2)), folded BN params
    w2 = jax.random.normal(k[6], (3, 3, Cm, C2), jnp.float32) * 0.1
    g2 = jax.random.uniform(k[7], (C2,), jnp.float32, 0.8, 1.2)
    b2 = jax.random.normal(k[8], (C2,), jnp.float32) * 0.1
    m2 = jax.random.normal(k[9], (C2,), jnp.float32) * 0.1
    v2 = jax.random.uniform(jax.random.fold_in(key, 99), (C2,), jnp.float32,
                            0.5, 1.5)
    s2 = g2 / jnp.sqrt(v2 + EPS)
    sb2 = jnp.stack([s2, b2 - m2 * s2], axis=0)             # (2, C2)

    ref = bottleneck_ref(x, w1, sb1, w2, sb2, shortcut=True)
    ref = jax.block_until_ready(ref)

    # Default production path: bf16 MXU inputs, f32 accumulation/epilogue.
    out_bf16 = bottleneck_pallas(x, w1, sb1, w2, sb2, shortcut=True)
    out_bf16 = jax.block_until_ready(out_bf16)

    # f32 MXU path for a tighter numerical check.
    out_f32 = bottleneck_pallas(x, w1, sb1, w2, sb2, shortcut=True,
                                mxu_dtype=jnp.float32)
    out_f32 = jax.block_until_ready(out_f32)

    assert out_bf16.shape == (N, H, W, C2), out_bf16.shape
    assert out_f32.shape == (N, H, W, C2), out_f32.shape

    err_f32 = float(jnp.max(jnp.abs(out_f32 - ref)))
    err_bf16 = float(jnp.max(jnp.abs(out_bf16 - ref)))
    assert jnp.allclose(out_f32, ref, atol=2e-2, rtol=2e-2), err_f32
    assert jnp.allclose(out_bf16, ref, atol=8e-2, rtol=8e-2), err_bf16

    print("KERNEL_OK")
</pallas_src>

<mosaic_0001>
module attributes {stable_mosaic.version = 11 : i64} {
  func.func @kernel(%arg0: i32, %arg1: memref<32x128xf32, #tpu.memory_space<vmem>>, %arg2: memref<128x64xbf16, #tpu.memory_space<vmem>>, %arg3: memref<1x64xf32, #tpu.memory_space<vmem>>, %arg4: memref<3x64x128xbf16, #tpu.memory_space<vmem>>, %arg5: memref<1x128xf32, #tpu.memory_space<vmem>>, %arg6: memref<32x128xf32, #tpu.memory_space<vmem>>) attributes {dimension_semantics = [#tpu.dimension_semantics<parallel>], iteration_bounds = array<i64: 2>, scalar_prefetch = 0 : i64, scratch_operands = 0 : i64, tpu.core_type = #tpu.core_type<tc>, window_params = [{transform_indices = @transform_0, window_bounds = array<i64: 32, 128>}, {pipeline_mode = #tpu.pipeline_mode<synchronous>, transform_indices = @transform_1, window_bounds = array<i64: 128, 64>}, {pipeline_mode = #tpu.pipeline_mode<synchronous>, transform_indices = @transform_2, window_bounds = array<i64: 1, 64>}, {pipeline_mode = #tpu.pipeline_mode<synchronous>, transform_indices = @transform_3, window_bounds = array<i64: 3, 64, 128>}, {pipeline_mode = #tpu.pipeline_mode<synchronous>, transform_indices = @transform_4, window_bounds = array<i64: 1, 128>}, {transform_indices = @transform_5, window_bounds = array<i64: 32, 128>}]} {
    %c0 = arith.constant 0 : index
    %c0_0 = arith.constant 0 : index
    %0 = vector.load %arg1[%c0, %c0_0] : memref<32x128xf32, #tpu.memory_space<vmem>>, vector<32x128xf32>
    %1 = arith.truncf %0 : vector<32x128xf32> to vector<32x128xbf16>
    %c0_1 = arith.constant 0 : index
    %c0_2 = arith.constant 0 : index
    %2 = vector.load %arg2[%c0_1, %c0_2] : memref<128x64xbf16, #tpu.memory_space<vmem>>, vector<128x64xbf16>
    %cst = arith.constant dense<0.000000e+00> : vector<32x64xf32>
    %3 = tpu.matmul %1, %2, %cst {dimension_numbers = #tpu.dot_dimension_numbers<[1], [0], [0], [1], [0, 0, 1, 1], [], []>} : vector<32x128xbf16>, vector<128x64xbf16>, vector<32x64xf32> -> vector<32x64xf32>
    %c0_3 = arith.constant 0 : index
    %c0_4 = arith.constant 0 : index
    %4 = vector.load %arg3[%c0_3, %c0_4] : memref<1x64xf32, #tpu.memory_space<vmem>>, vector<1x64xf32>
    %5 = vector.broadcast %4 : vector<1x64xf32> to vector<32x64xf32>
    %6 = arith.addf %3, %5 : vector<32x64xf32>
    %cst_5 = arith.constant 0.000000e+00 : f32
    %7 = vector.broadcast %cst_5 : f32 to vector<32x64xf32>
    %8 = arith.subf %7, %6 : vector<32x64xf32>
    %9 = math.exp %8 : vector<32x64xf32>
    %cst_6 = arith.constant 1.000000e+00 : f32
    %10 = vector.broadcast %cst_6 : f32 to vector<32x64xf32>
    %11 = arith.addf %10, %9 : vector<32x64xf32>
    %12 = tpu.reciprocal %11 {approx = true} : vector<32x64xf32> -> vector<32x64xf32>
    %13 = arith.mulf %6, %12 : vector<32x64xf32>
    %14 = tpu.iota {dimensions = array<i32: 0>} : vector<32x1xi32>
    %c16_i32 = arith.constant 16 : i32
    %c0_i32 = arith.constant 0 : i32
    %15 = arith.cmpi eq, %c16_i32, %c0_i32 : i32
    %c1_i32 = arith.constant 1 : i32
    %16 = arith.select %15, %c1_i32, %c16_i32 : i32
    %17 = vector.broadcast %16 : i32 to vector<32x1xi32>
    %18 = arith.remsi %14, %17 : vector<32x1xi32>
    %c0_i32_7 = arith.constant 0 : i32
    %19 = vector.broadcast %c0_i32_7 : i32 to vector<32x1xi32>
    %20 = arith.cmpi ne, %18, %19 : vector<32x1xi32>
    %c0_i32_8 = arith.constant 0 : i32
    %21 = vector.broadcast %c0_i32_8 : i32 to vector<32x1xi32>
    %22 = arith.cmpi slt, %18, %21 : vector<32x1xi32>
    %c0_i32_9 = arith.constant 0 : i32
    %23 = arith.cmpi slt, %16, %c0_i32_9 : i32
    %24 = vector.broadcast %23 : i1 to vector<32x1xi1>
    %25 = vector.broadcast %24 : vector<32x1xi1> to vector<32x1xi1>
    %26 = arith.xori %22, %25 : vector<32x1xi1>
    %27 = arith.andi %26, %20 : vector<32x1xi1>
    %28 = vector.broadcast %16 : i32 to vector<32x1xi32>
    %29 = arith.addi %18, %28 : vector<32x1xi32>
    %30 = arith.select %27, %29, %18 : vector<32x1xi1>, vector<32x1xi32>
    %c0_i32_10 = arith.constant 0 : i32
    %31 = vector.broadcast %c0_i32_10 : i32 to vector<32x1xi32>
    %32 = arith.cmpi eq, %30, %31 : vector<32x1xi32>
    %c16_i32_11 = arith.constant 16 : i32
    %c0_i32_12 = arith.constant 0 : i32
    %33 = arith.cmpi eq, %c16_i32_11, %c0_i32_12 : i32
    %c1_i32_13 = arith.constant 1 : i32
    %34 = arith.select %33, %c1_i32_13, %c16_i32_11 : i32
    %35 = vector.broadcast %34 : i32 to vector<32x1xi32>
    %36 = arith.remsi %14, %35 : vector<32x1xi32>
    %c0_i32_14 = arith.constant 0 : i32
    %37 = vector.broadcast %c0_i32_14 : i32 to vector<32x1xi32>
    %38 = arith.cmpi ne, %36, %37 : vector<32x1xi32>
    %c0_i32_15 = arith.constant 0 : i32
    %39 = vector.broadcast %c0_i32_15 : i32 to vector<32x1xi32>
    %40 = arith.cmpi slt, %36, %39 : vector<32x1xi32>
    %c0_i32_16 = arith.constant 0 : i32
    %41 = arith.cmpi slt, %34, %c0_i32_16 : i32
    %42 = vector.broadcast %41 : i1 to vector<32x1xi1>
    %43 = vector.broadcast %42 : vector<32x1xi1> to vector<32x1xi1>
    %44 = arith.xori %40, %43 : vector<32x1xi1>
    %45 = arith.andi %44, %38 : vector<32x1xi1>
    %46 = vector.broadcast %34 : i32 to vector<32x1xi32>
    %47 = arith.addi %36, %46 : vector<32x1xi32>
    %48 = arith.select %45, %47, %36 : vector<32x1xi1>, vector<32x1xi32>
    %c15_i32 = arith.constant 15 : i32
    %49 = vector.broadcast %c15_i32 : i32 to vector<32x1xi32>
    %50 = arith.cmpi eq, %48, %49 : vector<32x1xi32>
    %c1_i32_17 = arith.constant 1 : i32
    %51 = tpu.dynamic_rotate %13 by %c1_i32_17 dim 0 : vector<32x64xf32>, i32 -> vector<32x64xf32>
    %cst_18 = arith.constant 0.000000e+00 : f32
    %52 = vector.shape_cast %32 : vector<32x1xi1> to vector<32x1xi1>
    %53 = vector.broadcast %52 : vector<32x1xi1> to vector<32x64xi1>
    %54 = vector.broadcast %cst_18 : f32 to vector<32x64xf32>
    %55 = arith.select %53, %54, %51 : vector<32x64xi1>, vector<32x64xf32>
    %c31_i32 = arith.constant 31 : i32
    %56 = tpu.dynamic_rotate %13 by %c31_i32 dim 0 : vector<32x64xf32>, i32 -> vector<32x64xf32>
    %cst_19 = arith.constant 0.000000e+00 : f32
    %57 = vector.shape_cast %50 : vector<32x1xi1> to vector<32x1xi1>
    %58 = vector.broadcast %57 : vector<32x1xi1> to vector<32x64xi1>
    %59 = vector.broadcast %cst_19 : f32 to vector<32x64xf32>
    %60 = arith.select %58, %59, %56 : vector<32x64xi1>, vector<32x64xf32>
    %61 = arith.truncf %55 : vector<32x64xf32> to vector<32x64xbf16>
    %c0_20 = arith.constant 0 : index
    %c0_21 = arith.constant 0 : index
    %c0_22 = arith.constant 0 : index
    %62 = vector.load %arg4[%c0_20, %c0_21, %c0_22] : memref<3x64x128xbf16, #tpu.memory_space<vmem>>, vector<1x64x128xbf16>
    %63 = vector.shape_cast %62 : vector<1x64x128xbf16> to vector<64x128xbf16>
    %cst_23 = arith.constant dense<0.000000e+00> : vector<32x128xf32>
    %64 = tpu.matmul %61, %63, %cst_23 {dimension_numbers = #tpu.dot_dimension_numbers<[1], [0], [0], [1], [0, 0, 1, 1], [], []>} : vector<32x64xbf16>, vector<64x128xbf16>, vector<32x128xf32> -> vector<32x128xf32>
    %65 = arith.truncf %13 : vector<32x64xf32> to vector<32x64xbf16>
    %c1 = arith.constant 1 : index
    %c0_24 = arith.constant 0 : index
    %c0_25 = arith.constant 0 : index
    %66 = vector.load %arg4[%c1, %c0_24, %c0_25] : memref<3x64x128xbf16, #tpu.memory_space<vmem>>, vector<1x64x128xbf16>
    %67 = vector.shape_cast %66 : vector<1x64x128xbf16> to vector<64x128xbf16>
    %cst_26 = arith.constant dense<0.000000e+00> : vector<32x128xf32>
    %68 = tpu.matmul %65, %67, %cst_26 {dimension_numbers = #tpu.dot_dimension_numbers<[1], [0], [0], [1], [0, 0, 1, 1], [], []>} : vector<32x64xbf16>, vector<64x128xbf16>, vector<32x128xf32> -> vector<32x128xf32>
    %69 = arith.addf %64, %68 : vector<32x128xf32>
    %70 = arith.truncf %60 : vector<32x64xf32> to vector<32x64xbf16>
    %c2 = arith.constant 2 : index
    %c0_27 = arith.constant 0 : index
    %c0_28 = arith.constant 0 : index
    %71 = vector.load %arg4[%c2, %c0_27, %c0_28] : memref<3x64x128xbf16, #tpu.memory_space<vmem>>, vector<1x64x128xbf16>
    %72 = vector.shape_cast %71 : vector<1x64x128xbf16> to vector<64x128xbf16>
    %cst_29 = arith.constant dense<0.000000e+00> : vector<32x128xf32>
    %73 = tpu.matmul %70, %72, %cst_29 {dimension_numbers = #tpu.dot_dimension_numbers<[1], [0], [0], [1], [0, 0, 1, 1], [], []>} : vector<32x64xbf16>, vector<64x128xbf16>, vector<32x128xf32> -> vector<32x128xf32>
    %74 = arith.addf %69, %73 : vector<32x128xf32>
    %c0_30 = arith.constant 0 : index
    %c0_31 = arith.constant 0 : index
    %75 = vector.load %arg5[%c0_30, %c0_31] : memref<1x128xf32, #tpu.memory_space<vmem>>, vector<1x128xf32>
    %76 = vector.broadcast %75 : vector<1x128xf32> to vector<32x128xf32>
    %77 = arith.addf %74, %76 : vector<32x128xf32>
    %cst_32 = arith.constant 0.000000e+00 : f32
    %78 = vector.broadcast %cst_32 : f32 to vector<32x128xf32>
    %79 = arith.subf %78, %77 : vector<32x128xf32>
    %80 = math.exp %79 : vector<32x128xf32>
    %cst_33 = arith.constant 1.000000e+00 : f32
    %81 = vector.broadcast %cst_33 : f32 to vector<32x128xf32>
    %82 = arith.addf %81, %80 : vector<32x128xf32>
    %83 = tpu.reciprocal %82 {approx = true} : vector<32x128xf32> -> vector<32x128xf32>
    %84 = arith.mulf %77, %83 : vector<32x128xf32>
    %85 = arith.addf %84, %0 : vector<32x128xf32>
    %c0_34 = arith.constant 0 : index
    %c0_35 = arith.constant 0 : index
    %86 = vector.load %arg6[%c0_34, %c0_35] : memref<32x128xf32, #tpu.memory_space<vmem>>, vector<32x128xf32>
    tpu.vector_store %arg6[%c0_34, %c0_35], %85 {strides = array<i32>} : memref<32x128xf32, #tpu.memory_space<vmem>>, vector<32x128xf32>,
    return
  }
  func.func @transform_0(%arg0: i32) -> (i32, i32) {
    %c0_i32 = arith.constant 0 : i32
    %c0_i32_0 = arith.constant 0 : i32
    return %arg0, %c0_i32 : i32, i32
  }
  func.func @transform_1(%arg0: i32) -> (i32, i32) {
    %c0_i32 = arith.constant 0 : i32
    %c0_i32_0 = arith.constant 0 : i32
    %c0_i32_1 = arith.constant 0 : i32
    return %c0_i32, %c0_i32_0 : i32, i32
  }
  func.func @transform_2(%arg0: i32) -> (i32, i32) {
    %c0_i32 = arith.constant 0 : i32
    %c0_i32_0 = arith.constant 0 : i32
    %c0_i32_1 = arith.constant 0 : i32
    return %c0_i32, %c0_i32_0 : i32, i32
  }
  func.func @transform_3(%arg0: i32) -> (i32, i32, i32) {
    %c0_i32 = arith.constant 0 : i32
    %c0_i32_0 = arith.constant 0 : i32
    %c0_i32_1 = arith.constant 0 : i32
    %c0_i32_2 = arith.constant 0 : i32
    return %c0_i32, %c0_i32_0, %c0_i32_1 : i32, i32, i32
  }
  func.func @transform_4(%arg0: i32) -> (i32, i32) {
    %c0_i32 = arith.constant 0 : i32
    %c0_i32_0 = arith.constant 0 : i32
    %c0_i32_1 = arith.constant 0 : i32
    return %c0_i32, %c0_i32_0 : i32, i32
  }
  func.func @transform_5(%arg0: i32) -> (i32, i32) {
    %c0_i32 = arith.constant 0 : i32
    %c0_i32_0 = arith.constant 0 : i32
    return %arg0, %c0_i32 : i32, i32
  }
}

module attributes {stable_mosaic.version = 11 : i64} {
  func.func @kernel(%arg0: i32, %arg1: memref<32x128xf32, #tpu.memory_space<vmem>>, %arg2: memref<128x64xbf16, #tpu.memory_space<vmem>>, %arg3: memref<1x64xf32, #tpu.memory_space<vmem>>, %arg4: memref<3x64x128xbf16, #tpu.memory_space<vmem>>, %arg5: memref<1x128xf32, #tpu.memory_space<vmem>>, %arg6: memref<32x128xf32, #tpu.memory_space<vmem>>) attributes {dimension_semantics = [#tpu.dimension_semantics<parallel>], iteration_bounds = array<i64: 2>, scalar_prefetch = 0 : i64, scratch_operands = 0 : i64, tpu.core_type = #tpu.core_type<tc>, window_params = [{transform_indices = @transform_0, window_bounds = array<i64: 32, 128>}, {pipeline_mode = #tpu.pipeline_mode<synchronous>, transform_indices = @transform_1, window_bounds = array<i64: 128, 64>}, {pipeline_mode = #tpu.pipeline_mode<synchronous>, transform_indices = @transform_2, window_bounds = array<i64: 1, 64>}, {pipeline_mode = #tpu.pipeline_mode<synchronous>, transform_indices = @transform_3, window_bounds = array<i64: 3, 64, 128>}, {pipeline_mode = #tpu.pipeline_mode<synchronous>, transform_indices = @transform_4, window_bounds = array<i64: 1, 128>}, {transform_indices = @transform_5, window_bounds = array<i64: 32, 128>}]} {
    %c0 = arith.constant 0 : index
    %c0_0 = arith.constant 0 : index
    %0 = vector.load %arg1[%c0, %c0_0] : memref<32x128xf32, #tpu.memory_space<vmem>>, vector<32x128xf32>
    %1 = arith.truncf %0 : vector<32x128xf32> to vector<32x128xbf16>
    %c0_1 = arith.constant 0 : index
    %c0_2 = arith.constant 0 : index
    %2 = vector.load %arg2[%c0_1, %c0_2] : memref<128x64xbf16, #tpu.memory_space<vmem>>, vector<128x64xbf16>
    %cst = arith.constant dense<0.000000e+00> : vector<32x64xf32>
    %3 = tpu.matmul %1, %2, %cst {dimension_numbers = #tpu.dot_dimension_numbers<[1], [0], [0], [1], [0, 0, 1, 1], [], []>} : vector<32x128xbf16>, vector<128x64xbf16>, vector<32x64xf32> -> vector<32x64xf32>
    %c0_3 = arith.constant 0 : index
    %c0_4 = arith.constant 0 : index
    %4 = vector.load %arg3[%c0_3, %c0_4] : memref<1x64xf32, #tpu.memory_space<vmem>>, vector<1x64xf32>
    %5 = vector.broadcast %4 : vector<1x64xf32> to vector<32x64xf32>
    %6 = arith.addf %3, %5 : vector<32x64xf32>
    %cst_5 = arith.constant 0.000000e+00 : f32
    %7 = vector.broadcast %cst_5 : f32 to vector<32x64xf32>
    %8 = arith.subf %7, %6 : vector<32x64xf32>
    %9 = math.exp %8 : vector<32x64xf32>
    %cst_6 = arith.constant 1.000000e+00 : f32
    %10 = vector.broadcast %cst_6 : f32 to vector<32x64xf32>
    %11 = arith.addf %10, %9 : vector<32x64xf32>
    %12 = tpu.reciprocal %11 {approx = true} : vector<32x64xf32> -> vector<32x64xf32>
    %13 = arith.mulf %6, %12 : vector<32x64xf32>
    %14 = tpu.iota {dimensions = array<i32: 0>} : vector<32x32xi32>
    %15 = tpu.iota {dimensions = array<i32: 1>} : vector<32x32xi32>
    %c1_i32 = arith.constant 1 : i32
    %16 = vector.broadcast %c1_i32 : i32 to vector<32x32xi32>
    %17 = arith.subi %14, %16 : vector<32x32xi32>
    %18 = arith.cmpi eq, %15, %17 : vector<32x32xi32>
    %c16_i32 = arith.constant 16 : i32
    %c0_i32 = arith.constant 0 : i32
    %19 = arith.cmpi eq, %c16_i32, %c0_i32 : i32
    %c1_i32_7 = arith.constant 1 : i32
    %20 = arith.select %19, %c1_i32_7, %c16_i32 : i32
    %21 = vector.broadcast %20 : i32 to vector<32x32xi32>
    %22 = arith.remsi %14, %21 : vector<32x32xi32>
    %c0_i32_8 = arith.constant 0 : i32
    %23 = vector.broadcast %c0_i32_8 : i32 to vector<32x32xi32>
    %24 = arith.cmpi ne, %22, %23 : vector<32x32xi32>
    %c0_i32_9 = arith.constant 0 : i32
    %25 = vector.broadcast %c0_i32_9 : i32 to vector<32x32xi32>
    %26 = arith.cmpi slt, %22, %25 : vector<32x32xi32>
    %c0_i32_10 = arith.constant 0 : i32
    %27 = arith.cmpi slt, %20, %c0_i32_10 : i32
    %28 = vector.broadcast %27 : i1 to vector<32x32xi1>
    %29 = vector.broadcast %28 : vector<32x32xi1> to vector<32x32xi1>
    %30 = arith.xori %26, %29 : vector<32x32xi1>
    %31 = arith.andi %30, %24 : vector<32x32xi1>
    %32 = vector.broadcast %20 : i32 to vector<32x32xi32>
    %33 = arith.addi %22, %32 : vector<32x32xi32>
    %34 = arith.select %31, %33, %22 : vector<32x32xi1>, vector<32x32xi32>
    %c0_i32_11 = arith.constant 0 : i32
    %35 = vector.broadcast %c0_i32_11 : i32 to vector<32x32xi32>
    %36 = arith.cmpi ne, %34, %35 : vector<32x32xi32>
    %37 = arith.andi %18, %36 : vector<32x32xi1>
    %38 = arith.extui %37 : vector<32x32xi1> to vector<32x32xi32>
    %39 = arith.sitofp %38 : vector<32x32xi32> to vector<32x32xf32>
    %c1_i32_12 = arith.constant 1 : i32
    %40 = vector.broadcast %c1_i32_12 : i32 to vector<32x32xi32>
    %41 = arith.addi %14, %40 : vector<32x32xi32>
    %42 = arith.cmpi eq, %15, %41 : vector<32x32xi32>
    %c16_i32_13 = arith.constant 16 : i32
    %c0_i32_14 = arith.constant 0 : i32
    %43 = arith.cmpi eq, %c16_i32_13, %c0_i32_14 : i32
    %c1_i32_15 = arith.constant 1 : i32
    %44 = arith.select %43, %c1_i32_15, %c16_i32_13 : i32
    %45 = vector.broadcast %44 : i32 to vector<32x32xi32>
    %46 = arith.remsi %14, %45 : vector<32x32xi32>
    %c0_i32_16 = arith.constant 0 : i32
    %47 = vector.broadcast %c0_i32_16 : i32 to vector<32x32xi32>
    %48 = arith.cmpi ne, %46, %47 : vector<32x32xi32>
    %c0_i32_17 = arith.constant 0 : i32
    %49 = vector.broadcast %c0_i32_17 : i32 to vector<32x32xi32>
    %50 = arith.cmpi slt, %46, %49 : vector<32x32xi32>
    %c0_i32_18 = arith.constant 0 : i32
    %51 = arith.cmpi slt, %44, %c0_i32_18 : i32
    %52 = vector.broadcast %51 : i1 to vector<32x32xi1>
    %53 = vector.broadcast %52 : vector<32x32xi1> to vector<32x32xi1>
    %54 = arith.xori %50, %53 : vector<32x32xi1>
    %55 = arith.andi %54, %48 : vector<32x32xi1>
    %56 = vector.broadcast %44 : i32 to vector<32x32xi32>
    %57 = arith.addi %46, %56 : vector<32x32xi32>
    %58 = arith.select %55, %57, %46 : vector<32x32xi1>, vector<32x32xi32>
    %c15_i32 = arith.constant 15 : i32
    %59 = vector.broadcast %c15_i32 : i32 to vector<32x32xi32>
    %60 = arith.cmpi ne, %58, %59 : vector<32x32xi32>
    %61 = arith.andi %42, %60 : vector<32x32xi1>
    %62 = arith.extui %61 : vector<32x32xi1> to vector<32x32xi32>
    %63 = arith.sitofp %62 : vector<32x32xi32> to vector<32x32xf32>
    %cst_19 = arith.constant dense<0.000000e+00> : vector<32x64xf32>
    %64 = tpu.matmul %39, %13, %cst_19 {dimension_numbers = #tpu.dot_dimension_numbers<[1], [0], [0], [1], [0, 0, 1, 1], [], []>} : vector<32x32xf32>, vector<32x64xf32>, vector<32x64xf32> -> vector<32x64xf32>
    %cst_20 = arith.constant dense<0.000000e+00> : vector<32x64xf32>
    %65 = tpu.matmul %63, %13, %cst_20 {dimension_numbers = #tpu.dot_dimension_numbers<[1], [0], [0], [1], [0, 0, 1, 1], [], []>} : vector<32x32xf32>, vector<32x64xf32>, vector<32x64xf32> -> vector<32x64xf32>
    %66 = arith.truncf %64 : vector<32x64xf32> to vector<32x64xbf16>
    %c0_21 = arith.constant 0 : index
    %c0_22 = arith.constant 0 : index
    %c0_23 = arith.constant 0 : index
    %67 = vector.load %arg4[%c0_21, %c0_22, %c0_23] : memref<3x64x128xbf16, #tpu.memory_space<vmem>>, vector<1x64x128xbf16>
    %68 = vector.shape_cast %67 : vector<1x64x128xbf16> to vector<64x128xbf16>
    %cst_24 = arith.constant dense<0.000000e+00> : vector<32x128xf32>
    %69 = tpu.matmul %66, %68, %cst_24 {dimension_numbers = #tpu.dot_dimension_numbers<[1], [0], [0], [1], [0, 0, 1, 1], [], []>} : vector<32x64xbf16>, vector<64x128xbf16>, vector<32x128xf32> -> vector<32x128xf32>
    %70 = arith.truncf %13 : vector<32x64xf32> to vector<32x64xbf16>
    %c1 = arith.constant 1 : index
    %c0_25 = arith.constant 0 : index
    %c0_26 = arith.constant 0 : index
    %71 = vector.load %arg4[%c1, %c0_25, %c0_26] : memref<3x64x128xbf16, #tpu.memory_space<vmem>>, vector<1x64x128xbf16>
    %72 = vector.shape_cast %71 : vector<1x64x128xbf16> to vector<64x128xbf16>
    %cst_27 = arith.constant dense<0.000000e+00> : vector<32x128xf32>
    %73 = tpu.matmul %70, %72, %cst_27 {dimension_numbers = #tpu.dot_dimension_numbers<[1], [0], [0], [1], [0, 0, 1, 1], [], []>} : vector<32x64xbf16>, vector<64x128xbf16>, vector<32x128xf32> -> vector<32x128xf32>
    %74 = arith.addf %69, %73 : vector<32x128xf32>
    %75 = arith.truncf %65 : vector<32x64xf32> to vector<32x64xbf16>
    %c2 = arith.constant 2 : index
    %c0_28 = arith.constant 0 : index
    %c0_29 = arith.constant 0 : index
    %76 = vector.load %arg4[%c2, %c0_28, %c0_29] : memref<3x64x128xbf16, #tpu.memory_space<vmem>>, vector<1x64x128xbf16>
    %77 = vector.shape_cast %76 : vector<1x64x128xbf16> to vector<64x128xbf16>
    %cst_30 = arith.constant dense<0.000000e+00> : vector<32x128xf32>
    %78 = tpu.matmul %75, %77, %cst_30 {dimension_numbers = #tpu.dot_dimension_numbers<[1], [0], [0], [1], [0, 0, 1, 1], [], []>} : vector<32x64xbf16>, vector<64x128xbf16>, vector<32x128xf32> -> vector<32x128xf32>
    %79 = arith.addf %74, %78 : vector<32x128xf32>
    %c0_31 = arith.constant 0 : index
    %c0_32 = arith.constant 0 : index
    %80 = vector.load %arg5[%c0_31, %c0_32] : memref<1x128xf32, #tpu.memory_space<vmem>>, vector<1x128xf32>
    %81 = vector.broadcast %80 : vector<1x128xf32> to vector<32x128xf32>
    %82 = arith.addf %79, %81 : vector<32x128xf32>
    %cst_33 = arith.constant 0.000000e+00 : f32
    %83 = vector.broadcast %cst_33 : f32 to vector<32x128xf32>
    %84 = arith.subf %83, %82 : vector<32x128xf32>
    %85 = math.exp %84 : vector<32x128xf32>
    %cst_34 = arith.constant 1.000000e+00 : f32
    %86 = vector.broadcast %cst_34 : f32 to vector<32x128xf32>
    %87 = arith.addf %86, %85 : vector<32x128xf32>
    %88 = tpu.reciprocal %87 {approx = true} : vector<32x128xf32> -> vector<32x128xf32>
    %89 = arith.mulf %82, %88 : vector<32x128xf32>
    %90 = arith.addf %89, %0 : vector<32x128xf32>
    %c0_35 = arith.constant 0 : index
    %c0_36 = arith.constant 0 : index
    %91 = vector.load %arg6[%c0_35, %c0_36] : memref<32x128xf32, #tpu.memory_space<vmem>>, vector<32x128xf32>
    tpu.vector_store %arg6[%c0_35, %c0_36], %90 {strides = array<i32>} : memref<32x128xf32, #tpu.memory_space<vmem>>, vector<32x128xf32>,
    return
  }
  func.func @transform_0(%arg0: i32) -> (i32, i32) {
    %c0_i32 = arith.constant 0 : i32
    %c0_i32_0 = arith.constant 0 : i32
    return %arg0, %c0_i32 : i32, i32
  }
  func.func @transform_1(%arg0: i32) -> (i32, i32) {
    %c0_i32 = arith.constant 0 : i32
    %c0_i32_0 = arith.constant 0 : i32
    %c0_i32_1 = arith.constant 0 : i32
    return %c0_i32, %c0_i32_0 : i32, i32
  }
  func.func @transform_2(%arg0: i32) -> (i32, i32) {
    %c0_i32 = arith.constant 0 : i32
    %c0_i32_0 = arith.constant 0 : i32
    %c0_i32_1 = arith.constant 0 : i32
    return %c0_i32, %c0_i32_0 : i32, i32
  }
  func.func @transform_3(%arg0: i32) -> (i32, i32, i32) {
    %c0_i32 = arith.constant 0 : i32
    %c0_i32_0 = arith.constant 0 : i32
    %c0_i32_1 = arith.constant 0 : i32
    %c0_i32_2 = arith.constant 0 : i32
    return %c0_i32, %c0_i32_0, %c0_i32_1 : i32, i32, i32
  }
  func.func @transform_4(%arg0: i32) -> (i32, i32) {
    %c0_i32 = arith.constant 0 : i32
    %c0_i32_0 = arith.constant 0 : i32
    %c0_i32_1 = arith.constant 0 : i32
    return %c0_i32, %c0_i32_0 : i32, i32
  }
  func.func @transform_5(%arg0: i32) -> (i32, i32) {
    %c0_i32 = arith.constant 0 : i32
    %c0_i32_0 = arith.constant 0 : i32
    return %arg0, %c0_i32 : i32, i32
  }
}

</mosaic_0001>

<bundles_post_ra>
// kernel: tpu_custom_call.1
= control target key start
LH: loop header
LB: loop body
LE: loop exit
PB: predicated region body
PF: predicated region fallthrough
CT: control target
= control target key end

     0   :  { %10 = vsyncpa [#allocation3], 0  ;;  %s1362_s0 = inlined_call_operand.hbm [shape: f32[64,128], index: 0, kind: input, shape index: {}]   ;;  %s1363_s1 = inlined_call_operand.vmem [shape: bf16[128,64], index: 1, kind: input, shape index: {}]   ;;  %s1364_s2 = inlined_call_operand.vmem [shape: f32[1,64], index: 2, kind: input, shape index: {}]   ;;  %s1365_s3 = inlined_call_operand.vmem [shape: bf16[3,64,128], index: 3, kind: input, shape index: {}]   ;;  %s1366_s4 = inlined_call_operand.vmem [shape: f32[1,128], index: 4, kind: input, shape index: {}]   ;;  %s1367_s5 = inlined_call_operand.hbm [shape: f32[64,128], index: 5, kind: output, shape index: {}]  }
   0x1   :  { %12 = vsyncpa [#allocation3 + $0x1], 0 }
   0x2   :  { %13 = vsyncpa [#allocation4], 0 }
   0x3   :  { %15 = vsyncpa [#allocation4 + $0x1], 0  ;;  %s1135_s18 = smov 0   ;;  %s1137_s19 = smov 0  }
   0x4   :  { %s1139_s20 = smov 0   ;;  %s1141_s21 = smov 0  }
   0x5 LB: > { %s1156_s22 = sadd.s32 4294967295, %s1099_s21   ;;  %s781_s23 = sadd.s32 4294967294, %s1099_s21   ;;  %s1099_s21 = sphi %s1141_s21, %s1377_s21   ;;  %s1095_s20 = sphi %s1139_s20, %s1376_s20   ;;  %s1091_s19 = sphi %s1137_s19, %s1375_s19   ;;  %s1087_s18 = sphi %s1135_s18, %s1374_s18  }
   0x6   : > { %s1160_s24 = sadd.s32 1, %s1099_s21   ;;  %s28_s25 = sadd.s32 1, %s1095_s20 }
   0x7   : > { %s25_s26 = ssub.s32 %s1099_s21, %s1160_s24  ;;  %p35_p0 = scmp.ne.s32.totalorder %s1095_s20, %s1091_s19 }
   0x8   : > { %p26_p1 = scmp.eq.s32.totalorder %s25_s26, 0  ;;  %p36_p2 = scmp.eq.s32.totalorder %s1099_s21, 0 }
   0x9   : > { %p41_p3 = scmp.ne.s32.totalorder %s1091_s19, %s1087_s18  ;;  %p42_p4 = scmp.eq.s32.totalorder %s1156_s22, 0 }
   0xa   : > { %s1172_s27 = scalar_select %p26_p1, %s1095_s20, %s28_s25  }
   0xb   : > { %p1174_p5 = por %p36_p2, %p35_p0  ;;  %p1178_p6 = por %p42_p4, %p41_p3 }
   0xc   : > { %p149_p7 = scmp.eq.s32.totalorder %s1156_s22, 1  ;;  %p155_p8 = scmp.eq.s32.totalorder %s781_s23, 1 }
   0xd   : > { %p931_p10 = scmp.lt.s32.totalorder %s1099_s21, 2  ;;  %s187_s7 = sand.u32 1, %s1095_s20  }
   0xe   : > { %p1185_p11 = por %p149_p7, %p35_p0  ;;  %p1189_p12 = por %p155_p8, %p41_p3 }
   0xf   : > { %s897_s8 = sshll.u32 %s1099_s21, 5  ;;  %s784_s9 = sshll.u32 %s187_s7, 5 }
  0x10   : > { %s196_s12 = scalar_lea.hbm %s1362_s0, %s897_s8  ;;  %s191_s14 = scalar_lea.vmem [#allocation2], %s784_s9 }
  0x11   : > { %s197_s13 = sshll.u32 %s196_s12, 4  ;;  %s199_s15 = sshll.u32 %s191_s14, 4  ;;  %s198_s13 = int_to_ptr.hbm [resolvable:$true] %s197_s13  ;;  %s200_s15 = int_to_ptr.vmem [resolvable:$true] %s199_s15 }
  0x12   : > { %p1200_p13 = pnand %p931_p10, %p1174_p5  ;;  %p787_p0 = scmp.ge.s32.totalorder %s1099_s21, 1 }
  0x13   : > { %p207_p1 = scmp.lt.s32.totalorder %s1099_s21, 3  ;;  %s188_s17 = scalar_lea.sflag [#allocation3], %s187_s7 }
  0x14   : > { %s1003_s23 = sshra.s32 %s198_s13, 4  ;;  %p1007_p3 = pneg %p1200_p13  ;;  %s1004_s23 = int_to_ptr.hbm [resolvable:$true] %s1003_s23 }
  0x15   : > { %s1005_s25 = scalar_lea.hbm %s1004_s23, 32  ;;  %s1010_s28 = scalar_lea.hbm %s1362_s0, 64 }
  0x16   : > { %p1006_p2 = scmp.ne.s32.totalorder %s1004_s23, %s1005_s25  ;;  %p1011_p5 = scmp.lt.s32.totalorder %s1004_s23, %s1362_s0 }
  0x17   : > { %p1012_p8 = scmp.lt.s32.totalorder %s1010_s28, %s1005_s25 }
  0x18   : > { %p1008_p4 = pnand %p1007_p3, %p1006_p2 }
  0x19   : > { %p1013_p10 = por %p1012_p8, %p1011_p5 }
  0x1a   : > { %p1009_p7 = pneg %p1008_p4 }
  0x1c   : > { %p1014_p9 = pnand %p1013_p10, %p1009_p7 }
  0x1e   : > { %1017 = shalt.err (!%p1014_p9)
}
  0x1f   : > { %s1101_s7 = smov 128   ;;  %s1102_s11 = smov 8  }
  0x20   : > { %926 = dma.hbm_to_vmem [thread:$0]  (!%p1200_p13), %s198_s13, 512, %s200_s15, %s188_s17, %s1101_s7, %s1101_s7, %s1102_s11  }
  0x21   : > { %p208_p2 = pnand %p787_p0, %p207_p1 }
  0x22   : > { %s1221_s12 = sand.u32 (!%p208_p2), 1, %s1091_s19  }
  0x23   : > { %211 = sbr.rel (%p208_p2) target bundleno = 443 (0x1bb), region = 40  ;;  %s788_s14 = sshll.u32 (!%p208_p2), %s1221_s12, 5 }
  0x24   : > { %s214_s23 = scalar_lea.sflag (!%p208_p2), [#allocation3], %s1221_s12  ;;  %s217_s25 = scalar_lea.vmem (!%p208_p2), [#allocation2], %s788_s14 }
  0x28   : > { %1078 = dma.done.wait (%p1178_p6), %s214_s23, 512  }
  0x29   : > { %1080 = vsyncadd (%p1178_p6), %s214_s23, 4294966784  ;;  %v905_v0 = vld [vmem:[%s1363_s1 + $0x38] sm:$0xff]  ;;  %v904_v1 = vld [vmem:[%s1363_s1 + $0x30] sm:$0xff]  ;;  %v365_v46 = vlaneseq  ;;  %vm513_vm0 = vcmask 523264   ;;  %s244_s17 = scalar_lea.vmem [#allocation5], %s788_s14  ;;  %s918_s26 = sshll.u32 %s1156_s22, 5 }
  0x2a   : > { %322 = vmatpush.bf16.msra.mxu0 %v905_v0  ;;  %v903_v2 = vld [vmem:[%s1363_s1 + $0x28] sm:$0xff]  ;;  %v902_v3 = vld [vmem:[%s1363_s1 + $0x20] sm:$0xff]  ;;  %v901_v4 = vld [vmem:[%s1363_s1 + $0x18] sm:$0xff]  ;;  %s704_s28 = scalar_lea.hbm %s1367_s5, %s918_s26  ;;  %s705_s9 = sshll.u32 %s244_s17, 4  ;;  %s706_s9 = int_to_ptr.vmem [resolvable:$true] %s705_s9 }
  0x2b   : > { %v900_v5 = vld [vmem:[%s1363_s1 + $0x10] sm:$0xff]  ;;  %v899_v6 = vld [vmem:[%s1363_s1 + $0x8] sm:$0xff]  ;;  %v898_v7 = vld [vmem:[%s1363_s1] sm:$0xff]  ;;  %v366_v54 = vshrl.u32 %v365_v46, 7  ;;  %s707_s29 = sshll.u32 %s704_s28, 4  ;;  %s1053_s23 = scalar_lea.hbm %s1367_s5, 64  ;;  %s708_s29 = int_to_ptr.hbm [resolvable:$true] %s707_s29 }
  0x2c   : > { %v1255_v8 = vld [vmem:[%s217_s25] sm:$0xff]  ;;  %v1257_v9 = vld [vmem:[%s217_s25 + $0x8] sm:$0xff]  ;;  %v1261_v11 = vld [vmem:[%s217_s25 + $0x10] sm:$0xff]  ;;  %s1047_s22 = sshra.s32 %s708_s29, 4  ;;  %s1048_s22 = int_to_ptr.hbm [resolvable:$true] %s1047_s22 }
  0x2d   : > { %v252_v10 = vpack.c.bf16 %v1257_v9, %v1255_v8  ;;  %v1263_v12 = vld [vmem:[%s217_s25 + $0x18] sm:$0xff]  ;;  %v912_v15 = vld [vmem:[%s1365_s3 + $0x30] sm:$0xff]  ;;  %v911_v16 = vld [vmem:[%s1365_s3 + $0x28] sm:$0xff]  ;;  %v367_v56 = vadd.s32 8, %v366_v54  ;;  %vm451_vm2 = vcmp.lt.s32.totalorder %v366_v54, 7  ;;  %vm430_vm3 = vcmp.lt.s32.totalorder %v366_v54, 1  ;;  %p1054_p0 = scmp.lt.s32.totalorder %s1048_s22, %s1367_s5 }
  0x2e   : > { %323 = vmatpush.bf16.msra.mxu0 %v904_v1  ;;  %v253_v13 = vpack.c.bf16 %v1263_v12, %v1261_v11  ;;  %v913_v14 = vld [vmem:[%s1365_s3 + $0x38] sm:$0xff]  ;;  %v969_v17 = vld [vmem:[%s1364_s2] ss:$0 sm:$0xff]  ;;  %v916_v22 = vld [vmem:[%s1365_s3 + $0x50] sm:$0xff]  ;;  %s693_s25 = scalar_lea.sflag [#allocation4], %s1221_s12  ;;  %s1049_s10 = scalar_lea.hbm %s1048_s22, 32 }
  0x2f   : > { %524 = vmatpush.bf16.msra.mxu1 %v913_v14  ;;  %v910_v18 = vld [vmem:[%s1365_s3 + $0x20] sm:$0xff]  ;;  %v917_v19 = vld [vmem:[%s1365_s3 + $0x58] sm:$0xff]  ;;  %v915_v26 = vld [vmem:[%s1365_s3 + $0x48] sm:$0xff]  ;;  %v381_v58 = vand.u32 15, %v367_v56  ;;  %p1050_p6 = scmp.ne.s32.totalorder %s1048_s22, %s1049_s10  ;;  %p1055_p1 = scmp.lt.s32.totalorder %s1053_s23, %s1049_s10 }
  0x30   : > { %633 = vmatpush.bf16.msra.mxu3 %v917_v19  ;;  %v909_v25 = vld [vmem:[%s1365_s3 + $0x18] sm:$0xff]  ;;  %v908_v29 = vld [vmem:[%s1365_s3 + $0x10] sm:$0xff]  ;;  %v914_v30 = vld [vmem:[%s1365_s3 + $0x40] sm:$0xff] }
  0x31   : > { %573 = vmatpush.bf16.msra.mxu2 %v909_v25  ;;  %v907_v33 = vld [vmem:[%s1365_s3 + $0x8] sm:$0xff]  ;;  %v906_v38 = vld [vmem:[%s1365_s3] sm:$0xff]  ;;  %vm423_vm1 = vcmp.eq.s32.totalorder %v381_v58, 15  ;;  %p1051_p9 = pnand %p1050_p6, %p1185_p11  ;;  %p1056_p3 = por %p1055_p1, %p1054_p0 }
  0x32   : > { %324 = vmatpush.bf16.msra.mxu0 %v903_v2 }
  0x33   : > { %525 = vmatpush.bf16.msra.mxu1 %v912_v15  ;;  %p1052_p13 = pneg %p1051_p9 }
  0x34   : > { %634 = vmatpush.bf16.msra.mxu3 %v916_v22 }
  0x35   : > { %574 = vmatpush.bf16.msra.mxu2 %v908_v29  ;;  %p1057_p4 = pnand %p1056_p3, %p1052_p13 }
  0x36   : > { %325 = vmatpush.bf16.msra.mxu0 %v902_v3 }
  0x37   : > { %526 = vmatpush.bf16.msra.mxu1 %v911_v16 }
  0x38   : > { %635 = vmatpush.bf16.msra.mxu3 %v915_v26 }
  0x39   : > { %575 = vmatpush.bf16.msra.mxu2 %v907_v33 }
  0x3a   : > { %326 = vmatpush.bf16.msra.mxu0 %v901_v4 }
  0x3b   : > { %527 = vmatpush.bf16.msra.mxu1 %v910_v18 }
  0x3c   : > { %636 = vmatpush.bf16.msra.mxu3 %v914_v30 }
  0x3d   : > { %576 = vmatpush.bf16.msra.mxu2 %v906_v38  ;;  %v970_v38 = vld [vmem:[%s1366_s4] ss:$0 sm:$0xff] }
  0x3e   : > { %327 = vmatpush.bf16.msra.mxu0 %v900_v5  ;;  %v374_v5 = vand.u32 15, %v366_v54 }
  0x40   : > { %vm418_vm4 = vcmp.eq.s32.totalorder %v374_v5, 0 }
  0x42   : > { %328 = vmatpush.bf16.msra.mxu0 %v899_v6 }
  0x46   : > { %329 = vmatpush.bf16.msra.mxu0 %v898_v7 }
  0x49   : > { %330 = vmatmul.bf16.vlgmr.msra.gmra.mxu0 %v252_v10  ;;  %v369_v10 = vadd.s32 24, %v366_v54 }
  0x4b   : > { %v395_v19 = vand.u32 15, %v369_v10 }
  0x4d   : > { %vm425_vm5 = vcmp.eq.s32.totalorder %v395_v19, 15 }
  0x59   : > { %335 = vmatmul.bf16.gmra.mxu0 %v253_v13 }
  0xc6   : > { %v331_v20 = vpop.f32.mrf.mxu0 }
  0xc7   : > { %v332_v21 = vadd.f32 %v969_v17, %v331_v20 }
  0xc9   : > { %v341_v23 = vsub.f32 0.0, %v332_v21 }
  0xcb   : > { %v345_v24 = vmul.f32 1.442695, %v341_v23 }
  0xcd   : > { %971 = vpow2.f32 %v345_v24  ;;  %v368_v24 = vadd.s32 16, %v366_v54 }
  0xce   : > { %v333_v27 = vpop.f32.mrf.mxu0 }
  0xcf   : > { %v334_v28 = vadd.f32 %v969_v17, %v333_v27  ;;  %v388_v29 = vand.u32 15, %v368_v24 }
  0xd1   : > { %v342_v31 = vsub.f32 0.0, %v334_v28  ;;  %vm420_vm6 = vcmp.eq.s32.totalorder %v388_v29, 0 }
  0xd3   : > { %v347_v32 = vmul.f32 1.442695, %v342_v31  ;;  %v972_v34 = vpop.eup %971 }
  0xd4   : > { %v353_v37 = vadd.f32 1.0, %v972_v34 }
  0xd5   : > { %973 = vpow2.f32 %v347_v32 }
  0xd6   : > { %v336_v35 = vpop.f32.mrf.mxu0  ;;  %975 = vrcp.f32 %v353_v37 }
  0xd7   : > { %v337_v36 = vadd.f32 %v969_v17, %v336_v35 }
  0xd9   : > { %v343_v39 = vsub.f32 0.0, %v337_v36 }
  0xdb   : > { %v974_v40 = vpop.eup %973  ;;  %v349_v41 = vmul.f32 1.442695, %v343_v39 }
  0xdc   : > { %v354_v42 = vadd.f32 1.0, %v974_v40  ;;  %v976_v47 = vpop.eup %975 }
  0xdd   : > { %977 = vpow2.f32 %v349_v41  ;;  %v361_v52 = vmul.f32 %v976_v47, %v332_v21 }
  0xde   : > { %979 = vrcp.f32 %v354_v42  ;;  %v338_v43 = vpop.f32.mrf.mxu0 }
  0xdf   : > { %v339_v44 = vadd.f32 %v969_v17, %v338_v43  ;;  %v447_v0 = vrot.slane %v361_v52, 1  ;;  %v426_v14 = vrot.slane %v361_v52, 7 }
  0xe1   : > { %v344_v45 = vsub.f32 0.0, %v339_v44 }
  0xe3   : > { %v978_v48 = vpop.eup %977  ;;  %v351_v49 = vmul.f32 1.442695, %v344_v45 }
  0xe4   : > { %v980_v50 = vpop.eup %979  ;;  %v355_v51 = vadd.f32 1.0, %v978_v48 }
  0xe5   : > { %v362_v53 = vmul.f32 %v980_v50, %v334_v28  ;;  %981 = vpow2.f32 %v351_v49 }
  0xe6   : > { %983 = vrcp.f32 %v355_v51 }
  0xe7   : > { %v478_v55 = vpack.c.bf16 %v362_v53, %v361_v52  ;;  %v448_v62 = vrot.slane %v362_v53, 1  ;;  %v427_v13 = vrot.slane %v362_v53, 7 }
  0xe9   : > { %846 = vmatmul.msk.bf16.vlgmr.msra.gmra.mxu1 %vm513_vm0, %v478_v55  ;;  %v454_v2 = vsel %vm451_vm2, %v447_v0, %v448_v62  ;;  %v433_v20 = vsel %vm430_vm3, %v426_v14, %v427_v13 }
  0xeb   : > { %v982_v57 = vpop.eup %981 }
  0xec   : > { %v984_v59 = vpop.eup %983  ;;  %v356_v60 = vadd.f32 1.0, %v982_v57 }
  0xed   : > { %v363_v61 = vmul.f32 %v984_v59, %v337_v36 }
  0xee   : > { %985 = vrcp.f32 %v356_v60 }
  0xef   : > { %v449_v63 = vrot.slane %v363_v61, 1  ;;  %v428_v27 = vrot.slane %v363_v61, 7 }
  0xf1   : > { %v453_v1 = vsel %vm451_vm2, %v448_v62, %v449_v63  ;;  %v432_v30 = vsel %vm430_vm3, %v427_v13, %v428_v27 }
  0xf2   : > { %v465_v3 = vsel %vm423_vm1, 0.0, %v453_v1  ;;  %v445_v32 = vsel %vm420_vm6, 0.0, %v432_v30 }
  0xf3   : > { %v588_v4 = vpack.c.bf16 %v465_v3, %v454_v2 }
  0xf4   : > { %v986_v6 = vpop.eup %985 }
  0xf5   : > { %v364_v7 = vmul.f32 %v986_v6, %v339_v44  ;;  %890 = vmatmul.msk.bf16.vlgmr.msra.gmra.mxu3 %vm513_vm0, %v588_v4 }
  0xf7   : > { %v429_v15 = vrot.slane %v364_v7, 7  ;;  %v479_v16 = vpack.c.bf16 %v364_v7, %v363_v61  ;;  %v450_v17 = vrot.slane %v364_v7, 1 }
  0xf9   : > { %847 = vmatmul.msk.bf16.gmra.mxu1 %vm513_vm0, %v479_v16  ;;  %v434_v18 = vsel %vm430_vm3, %v429_v15, %v426_v14  ;;  %v455_v23 = vsel %vm451_vm2, %v450_v17, %v447_v0  ;;  %v452_v25 = vsel %vm451_vm2, %v449_v63, %v450_v17  ;;  %v431_v31 = vsel %vm430_vm3, %v428_v27, %v429_v15 }
  0xfa   : > { %v443_v21 = vsel %vm418_vm4, 0.0, %v434_v18  ;;  %v467_v26 = vsel %vm425_vm5, 0.0, %v455_v23  ;;  %v469_v33 = vpack.c.bf16 %v431_v31, %v445_v32 }
  0xfb   : > { %v468_v22 = vpack.c.bf16 %v433_v20, %v443_v21  ;;  %v589_v28 = vpack.c.bf16 %v467_v26, %v452_v25 }
  0xfd   : > { %864 = vmatmul.msk.bf16.vlgmr.msra.gmra.mxu2 %vm513_vm0, %v468_v22 }
 0x105   : > { %891 = vmatmul.msk.bf16.gmra.mxu3 %vm513_vm0, %v589_v28 }
 0x10d   : > { %865 = vmatmul.msk.bf16.gmra.mxu2 %vm513_vm0, %v469_v33 }
 0x166   : > { %v529_v34 = vpop.f32.mrf.mxu1 }
 0x16e   : > { %v531_v40 = vpop.f32.mrf.mxu1 }
 0x176   : > { %v534_v49 = vpop.f32.mrf.mxu1 }
 0x178   : > { %v638_v35 = vpop.f32.mrf.mxu3 }
 0x17e   : > { %v536_v60 = vpop.f32.mrf.mxu1 }
 0x180   : > { %v578_v36 = vpop.f32.mrf.mxu2  ;;  %v640_v42 = vpop.f32.mrf.mxu3 }
 0x181   : > { %v579_v37 = vadd.f32 %v578_v36, %v529_v34 }
 0x183   : > { %v648_v39 = vadd.f32 %v638_v35, %v579_v37 }
 0x185   : > { %v656_v41 = vadd.f32 %v970_v38, %v648_v39 }
 0x187   : > { %v660_v43 = vsub.f32 0.0, %v656_v41 }
 0x188   : > { %v580_v44 = vpop.f32.mrf.mxu2  ;;  %v643_v51 = vpop.f32.mrf.mxu3 }
 0x189   : > { %v664_v45 = vmul.f32 1.442695, %v660_v43  ;;  %v581_v46 = vadd.f32 %v580_v44, %v531_v40 }
 0x18b   : > { %987 = vpow2.f32 %v664_v45  ;;  %v649_v47 = vadd.f32 %v640_v42, %v581_v46 }
 0x18d   : > { %v657_v48 = vadd.f32 %v970_v38, %v649_v47 }
 0x18f   : > { %v661_v50 = vsub.f32 0.0, %v657_v48 }
 0x190   : > { %v583_v52 = vpop.f32.mrf.mxu2  ;;  %v645_v3 = vpop.f32.mrf.mxu3 }
 0x191   : > { %v988_v53 = vpop.eup %987  ;;  %v666_v54 = vmul.f32 1.442695, %v661_v50  ;;  %v584_v55 = vadd.f32 %v583_v52, %v534_v49 }
 0x192   : > { %v672_v56 = vadd.f32 1.0, %v988_v53 }
 0x193   : > { %989 = vpow2.f32 %v666_v54  ;;  %v650_v57 = vadd.f32 %v643_v51, %v584_v55 }
 0x194   : > { %991 = vrcp.f32 %v672_v56 }
 0x195   : > { %v658_v58 = vadd.f32 %v970_v38, %v650_v57 }
 0x197   : > { %v662_v59 = vsub.f32 0.0, %v658_v58 }
 0x198   : > { %v585_v61 = vpop.f32.mrf.mxu2 }
 0x199   : > { %v990_v62 = vpop.eup %989  ;;  %v668_v63 = vmul.f32 1.442695, %v662_v59  ;;  %v586_v0 = vadd.f32 %v585_v61, %v536_v60 }
 0x19a   : > { %v992_v1 = vpop.eup %991  ;;  %v673_v2 = vadd.f32 1.0, %v990_v62 }
 0x19b   : > { %v680_v4 = vmul.f32 %v992_v1, %v656_v41  ;;  %993 = vpow2.f32 %v668_v63  ;;  %v651_v5 = vadd.f32 %v645_v3, %v586_v0 }
 0x19c   : > { %995 = vrcp.f32 %v673_v2 }
 0x19d   : > { %v684_v6 = vadd.f32 %v680_v4, %v1255_v8  ;;  %v659_v7 = vadd.f32 %v970_v38, %v651_v5 }
 0x19f   : > { %688 = vst [vmem:[%s244_s17] sm:$0xff] %v684_v6  ;;  %v663_v10 = vsub.f32 0.0, %v659_v7 }
 0x1a1   : > { %v994_v13 = vpop.eup %993  ;;  %v670_v14 = vmul.f32 1.442695, %v663_v10 }
 0x1a2   : > { %v996_v15 = vpop.eup %995  ;;  %v674_v16 = vadd.f32 1.0, %v994_v13 }
 0x1a3   : > { %v681_v17 = vmul.f32 %v996_v15, %v657_v48  ;;  %997 = vpow2.f32 %v670_v14 }
 0x1a4   : > { %999 = vrcp.f32 %v674_v16 }
 0x1a5   : > { %v685_v18 = vadd.f32 %v681_v17, %v1257_v9 }
 0x1a7   : > { %689 = vst [vmem:[%s244_s17 + $0x8] sm:$0xff] %v685_v18 }
 0x1a9   : > { %v998_v19 = vpop.eup %997 }
 0x1aa   : > { %v1000_v20 = vpop.eup %999  ;;  %v675_v8 = vadd.f32 1.0, %v998_v19 }
 0x1ab   : > { %v682_v21 = vmul.f32 %v1000_v20, %v658_v58 }
 0x1ac   : > { %1001 = vrcp.f32 %v675_v8 }
 0x1ad   : > { %v686_v22 = vadd.f32 %v682_v21, %v1261_v11 }
 0x1af   : > { %690 = vst [vmem:[%s244_s17 + $0x10] sm:$0xff] %v686_v22 }
 0x1b2   : > { %v1002_v23 = vpop.eup %1001 }
 0x1b3   : > { %v683_v9 = vmul.f32 %v1002_v23, %v659_v7 }
 0x1b5   : > { %v687_v24 = vadd.f32 %v683_v9, %v1263_v12 }
 0x1b7   : > { %691 = vst [vmem:[%s244_s17 + $0x18] sm:$0xff] %v687_v24 }
 0x1b8   : > { %1060 = shalt.err (!%p1057_p4)
}
 0x1b9   : > { %s1103_s12 = smov 128   ;;  %s1104_s16 = smov 8  }
 0x1ba   : > { %921 = dma.vmem_to_hbm [thread:$0]  (%p1185_p11), %s706_s9, 512, %s708_s29, %s693_s25, %s1103_s12, %s1103_s12, %s1104_s16  }
 0x1bb PF: > { %s722_s17 = sand.u32 1, %s1087_s18   ;;  %p1373_p7 = scmp.ge.s32.totalorder %s1099_s21, 2 }
 0x1bc   : > { %s723_s26 = scalar_lea.sflag [#allocation4], %s722_s17 }
 0x1bd   : > { %p928_p5 = pnand %p1373_p7, %p1189_p12 }
 0x1bf   : > { %p929_p8 = pneg %p928_p5 }
 0x1c1   : > { %1082 = dma.done.wait (%p929_p8), %s723_s26, 512  }
 0x1c2   : > { %1084 = vsyncadd (%p929_p8), %s723_s26, 4294966784  ;;  %p18_p10 = scmp.ge.s32.totalorder %s1160_s24, 4   ;;  %s1374_s18 = smov %s1091_s19 }
 0x1c3   : > { %s1375_s19 = smov %s1095_s20  ;;  %s1376_s20 = smov %s1172_s27 }
 0x1c4   : > { %s1377_s21 = smov %s1160_s24  ;;  %20 = sbr.rel (!%p18_p10) target bundleno = 5 (0x5), region = 87 }
 0x1c9   :  { %729 = vsyncpa [#allocation3], 1 }
 0x1ca   :  { %731 = vsyncpa [#allocation3 + $0x1], 1 }
 0x1cb   :  { %732 = vsyncpa [#allocation4], 1 }
 0x1cc   :  { %734 = vsyncpa [#allocation4 + $0x1], 1 }

// kernel: tpu_custom_call.1
= control target key start
LH: loop header
LB: loop body
LE: loop exit
PB: predicated region body
PF: predicated region fallthrough
CT: control target
= control target key end

     0   :  { %10 = vsyncpa [#allocation3], 0  ;;  %s1498_s0 = inlined_call_operand.hbm [shape: f32[64,128], index: 0, kind: input, shape index: {}]   ;;  %s1499_s1 = inlined_call_operand.vmem [shape: bf16[128,64], index: 1, kind: input, shape index: {}]   ;;  %s1500_s2 = inlined_call_operand.vmem [shape: f32[1,64], index: 2, kind: input, shape index: {}]   ;;  %s1501_s3 = inlined_call_operand.vmem [shape: bf16[3,64,128], index: 3, kind: input, shape index: {}]   ;;  %s1502_s4 = inlined_call_operand.vmem [shape: f32[1,128], index: 4, kind: input, shape index: {}]   ;;  %s1503_s5 = inlined_call_operand.hbm [shape: f32[64,128], index: 5, kind: output, shape index: {}]  }
   0x1   :  { %12 = vsyncpa [#allocation3 + $0x1], 0 }
   0x2   :  { %13 = vsyncpa [#allocation4], 0 }
   0x3   :  { %15 = vsyncpa [#allocation4 + $0x1], 0  ;;  %s1244_s18 = smov 0   ;;  %s1246_s19 = smov 0  }
   0x4   :  { %s1248_s20 = smov 0   ;;  %s1250_s21 = smov 0  }
   0x5 LB: > { %s1265_s22 = sadd.s32 4294967295, %s1207_s21   ;;  %s864_s23 = sadd.s32 4294967294, %s1207_s21   ;;  %s1207_s21 = sphi %s1250_s21, %s1513_s21   ;;  %s1203_s20 = sphi %s1248_s20, %s1512_s20   ;;  %s1199_s19 = sphi %s1246_s19, %s1511_s19   ;;  %s1195_s18 = sphi %s1244_s18, %s1510_s18  }
   0x6   : > { %s1269_s24 = sadd.s32 1, %s1207_s21   ;;  %s28_s25 = sadd.s32 1, %s1203_s20 }
   0x7   : > { %s25_s26 = ssub.s32 %s1207_s21, %s1269_s24  ;;  %p35_p0 = scmp.ne.s32.totalorder %s1203_s20, %s1199_s19 }
   0x8   : > { %p26_p1 = scmp.eq.s32.totalorder %s25_s26, 0  ;;  %p36_p2 = scmp.eq.s32.totalorder %s1207_s21, 0 }
   0x9   : > { %p41_p3 = scmp.ne.s32.totalorder %s1199_s19, %s1195_s18  ;;  %p42_p4 = scmp.eq.s32.totalorder %s1265_s22, 0 }
   0xa   : > { %s1281_s27 = scalar_select %p26_p1, %s1203_s20, %s28_s25  }
   0xb   : > { %p1283_p5 = por %p36_p2, %p35_p0  ;;  %p1287_p6 = por %p42_p4, %p41_p3 }
   0xc   : > { %p149_p7 = scmp.eq.s32.totalorder %s1265_s22, 1  ;;  %p155_p8 = scmp.eq.s32.totalorder %s864_s23, 1 }
   0xd   : > { %p1038_p10 = scmp.lt.s32.totalorder %s1207_s21, 2  ;;  %s187_s7 = sand.u32 1, %s1203_s20  }
   0xe   : > { %p1294_p11 = por %p149_p7, %p35_p0  ;;  %p1298_p12 = por %p155_p8, %p41_p3 }
   0xf   : > { %s1000_s8 = sshll.u32 %s1207_s21, 5  ;;  %s867_s9 = sshll.u32 %s187_s7, 5 }
  0x10   : > { %s196_s12 = scalar_lea.hbm %s1498_s0, %s1000_s8  ;;  %s191_s14 = scalar_lea.vmem [#allocation2], %s867_s9 }
  0x11   : > { %s197_s13 = sshll.u32 %s196_s12, 4  ;;  %s199_s15 = sshll.u32 %s191_s14, 4  ;;  %s198_s13 = int_to_ptr.hbm [resolvable:$true] %s197_s13  ;;  %s200_s15 = int_to_ptr.vmem [resolvable:$true] %s199_s15 }
  0x12   : > { %p1309_p13 = pnand %p1038_p10, %p1283_p5  ;;  %p870_p0 = scmp.ge.s32.totalorder %s1207_s21, 1 }
  0x13   : > { %p207_p1 = scmp.lt.s32.totalorder %s1207_s21, 3  ;;  %s188_s17 = scalar_lea.sflag [#allocation3], %s187_s7 }
  0x14   : > { %s1111_s23 = sshra.s32 %s198_s13, 4  ;;  %p1115_p3 = pneg %p1309_p13  ;;  %s1112_s23 = int_to_ptr.hbm [resolvable:$true] %s1111_s23 }
  0x15   : > { %s1113_s25 = scalar_lea.hbm %s1112_s23, 32  ;;  %s1118_s28 = scalar_lea.hbm %s1498_s0, 64 }
  0x16   : > { %p1114_p2 = scmp.ne.s32.totalorder %s1112_s23, %s1113_s25  ;;  %p1119_p5 = scmp.lt.s32.totalorder %s1112_s23, %s1498_s0 }
  0x17   : > { %p1120_p8 = scmp.lt.s32.totalorder %s1118_s28, %s1113_s25 }
  0x18   : > { %p1116_p4 = pnand %p1115_p3, %p1114_p2 }
  0x19   : > { %p1121_p10 = por %p1120_p8, %p1119_p5 }
  0x1a   : > { %p1117_p7 = pneg %p1116_p4 }
  0x1c   : > { %p1122_p9 = pnand %p1121_p10, %p1117_p7 }
  0x1e   : > { %1125 = shalt.err (!%p1122_p9)
}
  0x1f   : > { %s1209_s7 = smov 128   ;;  %s1210_s11 = smov 8  }
  0x20   : > { %1033 = dma.hbm_to_vmem [thread:$0]  (!%p1309_p13), %s198_s13, 512, %s200_s15, %s188_s17, %s1209_s7, %s1209_s7, %s1210_s11  }
  0x21   : > { %p208_p2 = pnand %p870_p0, %p207_p1 }
  0x22   : > { %s1330_s12 = sand.u32 (!%p208_p2), 1, %s1199_s19  }
  0x23   : > { %211 = sbr.rel (%p208_p2) target bundleno = 585 (0x249), region = 40  ;;  %s871_s14 = sshll.u32 (!%p208_p2), %s1330_s12, 5 }
  0x24   : > { %s214_s23 = scalar_lea.sflag (!%p208_p2), [#allocation3], %s1330_s12  ;;  %s217_s25 = scalar_lea.vmem (!%p208_p2), [#allocation2], %s871_s14 }
  0x28   : > { %1186 = dma.done.wait (%p1287_p6), %s214_s23, 512  }
  0x29   : > { %1188 = vsyncadd (%p1287_p6), %s214_s23, 4294966784  ;;  %v1008_v0 = vld [vmem:[%s1499_s1 + $0x38] sm:$0xff]  ;;  %v1007_v1 = vld [vmem:[%s1499_s1 + $0x30] sm:$0xff]  ;;  %v365_v32 = vlaneseq  ;;  %v1211_v60 = vmov 0.0   ;;  %vm468_vm7 = vcmask 261120   ;;  %vm596_vm14 = vcmask 523264  }
  0x2a   : > { %322 = vmatpush.bf16.msra.mxu0 %v1008_v0  ;;  %v1006_v2 = vld [vmem:[%s1499_s1 + $0x28] sm:$0xff]  ;;  %v1005_v3 = vld [vmem:[%s1499_s1 + $0x20] sm:$0xff]  ;;  %v1004_v4 = vld [vmem:[%s1499_s1 + $0x18] sm:$0xff]  ;;  %s244_s17 = scalar_lea.vmem [#allocation5], %s871_s14  ;;  %s1021_s26 = sshll.u32 %s1265_s22, 5 }
  0x2b   : > { %v1003_v5 = vld [vmem:[%s1499_s1 + $0x10] sm:$0xff]  ;;  %v1002_v6 = vld [vmem:[%s1499_s1 + $0x8] sm:$0xff]  ;;  %v1001_v7 = vld [vmem:[%s1499_s1] sm:$0xff]  ;;  %v366_v36 = vshrl.u32 %v365_v32, 7  ;;  %v1381_v42 = vand.u32 127, %v365_v32  ;;  %s787_s8 = scalar_lea.hbm %s1503_s5, %s1021_s26  ;;  %s788_s28 = sshll.u32 %s244_s17, 4  ;;  %s789_s28 = int_to_ptr.vmem [resolvable:$true] %s788_s28 }
  0x2c   : > { %v1364_v8 = vld [vmem:[%s217_s25] sm:$0xff]  ;;  %v1366_v9 = vld [vmem:[%s217_s25 + $0x8] sm:$0xff]  ;;  %v1370_v11 = vld [vmem:[%s217_s25 + $0x10] sm:$0xff]  ;;  %s790_s9 = sshll.u32 %s787_s8, 4  ;;  %s776_s29 = scalar_lea.sflag [#allocation4], %s1330_s12  ;;  %s791_s9 = int_to_ptr.hbm [resolvable:$true] %s790_s9 }
  0x2d   : > { %v252_v10 = vpack.c.bf16 %v1366_v9, %v1364_v8  ;;  %v1372_v12 = vld [vmem:[%s217_s25 + $0x18] sm:$0xff]  ;;  %v1077_v16 = vld [vmem:[%s1500_s2] ss:$0 sm:$0xff]  ;;  %v1379_v41 = vadd.s32 16, %v366_v36  ;;  %v905_v43 = vadd.s32 4294967295, %v366_v36  ;;  %v384_v44 = vand.u32 15, %v366_v36 }
  0x2e   : > { %323 = vmatpush.bf16.msra.mxu0 %v1007_v1  ;;  %v253_v13 = vpack.c.bf16 %v1372_v12, %v1370_v11  ;;  %v444_v50 = vadd.s32 1, %v366_v36  ;;  %v367_v52 = vadd.s32 8, %v366_v36  ;;  %v369_v56 = vadd.s32 24, %v366_v36  ;;  %v1016_v0 = vld [vmem:[%s1501_s3 + $0x38] sm:$0xff]  ;;  %s1155_s22 = sshra.s32 %s791_s9, 4  ;;  %s1161_s23 = scalar_lea.hbm %s1503_s5, 64  ;;  %s1156_s22 = int_to_ptr.hbm [resolvable:$true] %s1155_s22 }
  0x2f   : > { %v907_v45 = vadd.s32 4294967295, %v1379_v41  ;;  %v398_v46 = vand.u32 15, %v1379_v41  ;;  %vm376_vm0 = vcmp.eq.s32.totalorder %v1381_v42, %v905_v43  ;;  %vm428_vm1 = vcmp.ne.s32.totalorder %v384_v44, 0  ;;  %v1078_v43 = vld [vmem:[%s1502_s4] ss:$0 sm:$0xff]  ;;  %s1157_s10 = scalar_lea.hbm %s1156_s22, 32  ;;  %p1162_p0 = scmp.lt.s32.totalorder %s1156_s22, %s1503_s5 }
  0x30   : > { %vm432_vm4 = vmand %vm376_vm0, %vm428_vm1  ;;  %vm448_vm6 = vcmp.eq.s32.totalorder %v1381_v42, %v444_v50  ;;  %v391_v57 = vand.u32 15, %v367_v52  ;;  %v445_v58 = vadd.s32 1, %v367_v52  ;;  %v906_v1 = vadd.s32 4294967295, %v367_v52  ;;  %p1158_p6 = scmp.ne.s32.totalorder %s1156_s22, %s1157_s10  ;;  %p1163_p1 = scmp.lt.s32.totalorder %s1161_s23, %s1157_s10 }
  0x31   : > { %vm378_vm2 = vcmp.eq.s32.totalorder %v1381_v42, %v907_v45  ;;  %vm430_vm3 = vcmp.ne.s32.totalorder %v398_v46, 0  ;;  %v909_v61 = vsel %vm432_vm4, 1.0, %v1211_v60  ;;  %v913_v63 = vsel %vm448_vm6, 1.0, %v1211_v60 }
  0x32   : > { %324 = vmatpush.bf16.msra.mxu0 %v1006_v2  ;;  %vm434_vm5 = vmand %vm378_vm2, %vm430_vm3  ;;  %v908_v2 = vadd.s32 4294967295, %v369_v56  ;;  %vm449_vm8 = vcmp.eq.s32.totalorder %v1381_v42, %v445_v58  ;;  %vm453_vm9 = vcmp.ne.s32.totalorder %v391_v57, 15  ;;  %vm377_vm10 = vcmp.eq.s32.totalorder %v1381_v42, %v906_v1  ;;  %p1159_p9 = pnand %p1158_p6, %p1294_p11  ;;  %p1164_p3 = por %p1163_p1, %p1162_p0 }
  0x33   : > { %v911_v62 = vsel %vm434_vm5, 1.0, %v1211_v60  ;;  %vm457_vm12 = vmand %vm449_vm8, %vm453_vm9 }
  0x34   : > { %vm379_vm11 = vcmp.eq.s32.totalorder %v1381_v42, %v908_v2  ;;  %p1160_p13 = pneg %p1159_p9 }
  0x36   : > { %325 = vmatpush.bf16.msra.mxu0 %v1005_v3  ;;  %v1020_v3 = vld [vmem:[%s1501_s3 + $0x58] sm:$0xff]  ;;  %p1165_p4 = pnand %p1164_p3, %p1160_p13 }
  0x3a   : > { %326 = vmatpush.bf16.msra.mxu0 %v1004_v4  ;;  %v1012_v4 = vld [vmem:[%s1501_s3 + $0x18] sm:$0xff] }
  0x3e   : > { %327 = vmatpush.bf16.msra.mxu0 %v1003_v5  ;;  %v1015_v5 = vld [vmem:[%s1501_s3 + $0x30] sm:$0xff] }
  0x42   : > { %328 = vmatpush.bf16.msra.mxu0 %v1002_v6  ;;  %v1019_v6 = vld [vmem:[%s1501_s3 + $0x50] sm:$0xff] }
  0x46   : > { %329 = vmatpush.bf16.msra.mxu0 %v1001_v7  ;;  %v910_v7 = vsel %vm377_vm10, 1.0, %v1211_v60 }
  0x49   : > { %330 = vmatmul.bf16.vlgmr.msra.gmra.mxu0 %v252_v10  ;;  %v912_v10 = vsel %vm379_vm11, 1.0, %v1211_v60 }
  0x59   : > { %335 = vmatmul.bf16.gmra.mxu0 %v253_v13  ;;  %v914_v13 = vsel %vm457_vm12, 1.0, %v1211_v60 }
  0xc6   : > { %v331_v14 = vpop.f32.mrf.mxu0 }
  0xc7   : > { %v332_v20 = vadd.f32 %v1077_v16, %v331_v14  ;;  %v1014_v14 = vld [vmem:[%s1501_s3 + $0x28] sm:$0xff] }
  0xc9   : > { %v341_v23 = vsub.f32 0.0, %v332_v20 }
  0xcb   : > { %v345_v28 = vmul.f32 1.442695, %v341_v23  ;;  %v1011_v23 = vld [vmem:[%s1501_s3 + $0x10] sm:$0xff] }
  0xce   : > { %v333_v15 = vpop.f32.mrf.mxu0 }
  0xcf   : > { %v334_v18 = vadd.f32 %v1077_v16, %v333_v15  ;;  %v446_v15 = vadd.s32 1, %v1379_v41 }
  0xd1   : > { %v342_v22 = vsub.f32 0.0, %v334_v18  ;;  %vm450_vm13 = vcmp.eq.s32.totalorder %v1381_v42, %v446_v15 }
  0xd3   : > { %v347_v26 = vmul.f32 1.442695, %v342_v22 }
  0xd6   : > { %v336_v17 = vpop.f32.mrf.mxu0 }
  0xd7   : > { %v337_v19 = vadd.f32 %v1077_v16, %v336_v17  ;;  %v405_v17 = vand.u32 15, %v369_v56 }
  0xd9   : > { %v343_v21 = vsub.f32 0.0, %v337_v19  ;;  %vm455_vm0 = vcmp.ne.s32.totalorder %v405_v17, 15 }
  0xdb   : > { %v349_v24 = vmul.f32 1.442695, %v343_v21 }
  0xdd   : > { %1079 = vpow2.f32 %v349_v24  ;;  %v1018_v24 = vld [vmem:[%s1501_s3 + $0x48] sm:$0xff] }
  0xde   : > { %v338_v25 = vpop.f32.mrf.mxu0  ;;  %1081 = vpow2.f32 %v347_v26  ;;  %v1009_v26 = vld [vmem:[%s1501_s3] sm:$0xff] }
  0xdf   : > { %v339_v27 = vadd.f32 %v1077_v16, %v338_v25  ;;  %1083 = vpow2.f32 %v345_v28  ;;  %v1013_v16 = vld [vmem:[%s1501_s3 + $0x20] sm:$0xff]  ;;  %v1010_v25 = vld [vmem:[%s1501_s3 + $0x8] sm:$0xff] }
  0xe1   : > { %v344_v29 = vsub.f32 0.0, %v339_v27 }
  0xe3   : > { %v351_v30 = vmul.f32 1.442695, %v344_v29  ;;  %v1080_v31 = vpop.eup %1079 }
  0xe4   : > { %v1082_v33 = vpop.eup %1081  ;;  %v355_v34 = vadd.f32 1.0, %v1080_v31 }
  0xe5   : > { %1085 = vpow2.f32 %v351_v30  ;;  %v1084_v35 = vpop.eup %1083  ;;  %v354_v38 = vadd.f32 1.0, %v1082_v33 }
  0xe6   : > { %1087 = vrcp.f32 %v355_v34  ;;  %v353_v40 = vadd.f32 1.0, %v1084_v35 }
  0xeb   : > { %v1086_v37 = vpop.eup %1085 }
  0xec   : > { %v356_v39 = vadd.f32 1.0, %v1086_v37  ;;  %v1088_v47 = vpop.eup %1087 }
  0xed   : > { %v1389_v53 = vmul.f32 %v1088_v47, %v337_v19  ;;  %v915_v19 = vsel %vm450_vm13, 1.0, %v1211_v60 }
  0xee   : > { %1089 = vrcp.f32 %v356_v39 }
  0xef   : > { %1091 = vrcp.f32 %v354_v38 }
  0xf0   : > { %1093 = vrcp.f32 %v353_v40 }
  0xf4   : > { %v1090_v48 = vpop.eup %1089 }
  0xf5   : > { %v1385_v49 = vmul.f32 %v1090_v48, %v339_v27  ;;  %v1092_v51 = vpop.eup %1091  ;;  %v1017_v27 = vld [vmem:[%s1501_s3 + $0x40] sm:$0xff] }
  0xf6   : > { %v1094_v54 = vpop.eup %1093  ;;  %v362_v55 = vmul.f32 %v1092_v51, %v334_v18  ;;  %v447_v18 = vadd.s32 1, %v369_v56 }
  0xf7   : > { %493 = vmatpush.msra.mxu1 %v1385_v49  ;;  %1022 = vmatpush.msra.mxu3 %v1385_v49  ;;  %v361_v59 = vmul.f32 %v1094_v54, %v332_v20  ;;  %v562_v22 = vpack.c.bf16 %v1385_v49, %v1389_v53 }
  0xf8   : > { %534 = vmatpush.msra.mxu2 %v1385_v49  ;;  %vm451_vm15 = vcmp.eq.s32.totalorder %v1381_v42, %v447_v18 }
  0xf9   : > { %494 = vmatpush.msra.mxu1 %v1389_v53  ;;  %1023 = vmatpush.msra.mxu3 %v1389_v53  ;;  %v561_v20 = vpack.c.bf16 %v362_v55, %v361_v59  ;;  %vm459_vm1 = vmand %vm451_vm15, %vm455_vm0 }
  0xfa   : > { %535 = vmatpush.msra.mxu2 %v1389_v53  ;;  %v916_v21 = vsel %vm459_vm1, 1.0, %v1211_v60 }
  0xfb   : > { %495 = vmatpush.msra.mxu1 %v362_v55  ;;  %1024 = vmatpush.msra.mxu3 %v362_v55 }
  0xfc   : > { %536 = vmatpush.msra.mxu2 %v362_v55 }
  0xfd   : > { %496 = vmatpush.msra.mxu1 %v361_v59  ;;  %1025 = vmatpush.msra.mxu3 %v361_v59 }
  0xfe   : > { %537 = vmatpush.msra.mxu2 %v361_v59  ;;  %917 = vmatmul.msk.f32.vlgmr.msra.gmra.mxu1 %vm468_vm7, %v909_v61 }
  0xff   : > { %919 = vmatmul.msk.f32.vlgmr.msra.gmra.mxu3 %vm468_vm7, %v911_v62  ;;  %921 = vmatmul.msk.f32.vlgmr.msra.gmra.mxu2 %vm468_vm7, %v913_v63 }
 0x100   : > { %607 = vmatpush.bf16.msrb.mxu3 %v1016_v0  ;;  %716 = vmatpush.bf16.msrb.mxu2 %v1020_v3 }
 0x101   : > { %656 = vmatpush.bf16.msrb.mxu1 %v1012_v4 }
 0x104   : > { %608 = vmatpush.bf16.msrb.mxu3 %v1015_v5  ;;  %717 = vmatpush.bf16.msrb.mxu2 %v1019_v6 }
 0x105   : > { %657 = vmatpush.bf16.msrb.mxu1 %v1011_v23 }
 0x106   : > { %918 = vmatmul.msk.f32.gmra.mxu1 %vm468_vm7, %v910_v7 }
 0x107   : > { %920 = vmatmul.msk.f32.gmra.mxu3 %vm468_vm7, %v912_v10  ;;  %922 = vmatmul.msk.f32.gmra.mxu2 %vm468_vm7, %v914_v13 }
 0x108   : > { %609 = vmatpush.bf16.msrb.mxu3 %v1014_v14  ;;  %718 = vmatpush.bf16.msrb.mxu2 %v1018_v24 }
 0x109   : > { %658 = vmatpush.bf16.msrb.mxu1 %v1010_v25 }
 0x10c   : > { %610 = vmatpush.bf16.msrb.mxu3 %v1013_v16  ;;  %719 = vmatpush.bf16.msrb.mxu2 %v1017_v27 }
 0x10d   : > { %659 = vmatpush.bf16.msrb.mxu1 %v1009_v26 }
 0x10f   : > { %923 = vmatmul.msk.f32.gmra.mxu2 %vm468_vm7, %v915_v19  ;;  %949 = vmatmul.msk.bf16.vlgmr.msrb.gmra.mxu3 %vm596_vm14, %v561_v20 }
 0x117   : > { %924 = vmatmul.msk.f32.gmra.mxu2 %vm468_vm7, %v916_v21 }
 0x11f   : > { %950 = vmatmul.msk.bf16.gmra.mxu3 %vm596_vm14, %v562_v22 }
 0x17b   : > { %v498_v28 = vpop.f32.mrf.mxu1 }
 0x182   : > { %v539_v29 = vpop.f32.mrf.mxu2  ;;  %v504_v32 = vpop.f32.mrf.mxu3 }
 0x183   : > { %v501_v30 = vpop.f32.mrf.mxu1 }
 0x184   : > { %v551_v31 = vpack.c.bf16 %v501_v30, %v498_v28 }
 0x186   : > { %967 = vmatmul.msk.bf16.vlgmr.msrb.gmra.mxu1 %vm596_vm14, %v551_v31 }
 0x18a   : > { %v542_v33 = vpop.f32.mrf.mxu2  ;;  %v507_v35 = vpop.f32.mrf.mxu3 }
 0x18b   : > { %v671_v34 = vpack.c.bf16 %v542_v33, %v539_v29  ;;  %v552_v36 = vpack.c.bf16 %v507_v35, %v504_v32 }
 0x18d   : > { %993 = vmatmul.msk.bf16.vlgmr.msrb.gmra.mxu2 %vm596_vm14, %v671_v34 }
 0x192   : > { %v545_v37 = vpop.f32.mrf.mxu2  ;;  %v612_v41 = vpop.f32.mrf.mxu3 }
 0x196   : > { %968 = vmatmul.msk.bf16.gmra.mxu1 %vm596_vm14, %v552_v36 }
 0x19a   : > { %v548_v38 = vpop.f32.mrf.mxu2  ;;  %v614_v47 = vpop.f32.mrf.mxu3 }
 0x19b   : > { %v672_v39 = vpack.c.bf16 %v548_v38, %v545_v37 }
 0x19d   : > { %994 = vmatmul.msk.bf16.gmra.mxu2 %vm596_vm14, %v672_v39 }
 0x1a2   : > { %v617_v56 = vpop.f32.mrf.mxu3 }
 0x1aa   : > { %v619_v3 = vpop.f32.mrf.mxu3 }
 0x203   : > { %v661_v40 = vpop.f32.mrf.mxu1 }
 0x204   : > { %v662_v42 = vadd.f32 %v661_v40, %v612_v41 }
 0x20b   : > { %v663_v44 = vpop.f32.mrf.mxu1 }
 0x20c   : > { %v664_v50 = vadd.f32 %v663_v44, %v614_v47 }
 0x210   : > { %v721_v45 = vpop.f32.mrf.mxu2 }
 0x211   : > { %v731_v46 = vadd.f32 %v721_v45, %v662_v42 }
 0x213   : > { %v739_v48 = vadd.f32 %v1078_v43, %v731_v46  ;;  %v666_v54 = vpop.f32.mrf.mxu1 }
 0x214   : > { %v667_v59 = vadd.f32 %v666_v54, %v617_v56 }
 0x215   : > { %v743_v49 = vsub.f32 0.0, %v739_v48 }
 0x217   : > { %v747_v51 = vmul.f32 1.442695, %v743_v49 }
 0x218   : > { %v723_v52 = vpop.f32.mrf.mxu2 }
 0x219   : > { %1095 = vpow2.f32 %v747_v51  ;;  %v732_v53 = vadd.f32 %v723_v52, %v664_v50 }
 0x21b   : > { %v740_v55 = vadd.f32 %v1078_v43, %v732_v53  ;;  %v668_v1 = vpop.f32.mrf.mxu1 }
 0x21c   : > { %v669_v5 = vadd.f32 %v668_v1, %v619_v3 }
 0x21d   : > { %v744_v57 = vsub.f32 0.0, %v740_v55 }
 0x21f   : > { %v1096_v58 = vpop.eup %1095  ;;  %v749_v60 = vmul.f32 1.442695, %v744_v57 }
 0x220   : > { %v755_v61 = vadd.f32 1.0, %v1096_v58  ;;  %v726_v62 = vpop.f32.mrf.mxu2 }
 0x221   : > { %1097 = vpow2.f32 %v749_v60  ;;  %v733_v63 = vadd.f32 %v726_v62, %v667_v59 }
 0x222   : > { %1099 = vrcp.f32 %v755_v61 }
 0x223   : > { %v741_v0 = vadd.f32 %v1078_v43, %v733_v63 }
 0x225   : > { %v745_v2 = vsub.f32 0.0, %v741_v0 }
 0x227   : > { %v1098_v4 = vpop.eup %1097  ;;  %v751_v6 = vmul.f32 1.442695, %v745_v2 }
 0x228   : > { %v1100_v7 = vpop.eup %1099  ;;  %v756_v10 = vadd.f32 1.0, %v1098_v4  ;;  %v728_v13 = vpop.f32.mrf.mxu2 }
 0x229   : > { %v763_v14 = vmul.f32 %v1100_v7, %v739_v48  ;;  %1101 = vpow2.f32 %v751_v6  ;;  %v734_v15 = vadd.f32 %v728_v13, %v669_v5 }
 0x22a   : > { %1103 = vrcp.f32 %v756_v10 }
 0x22b   : > { %v767_v16 = vadd.f32 %v763_v14, %v1364_v8  ;;  %v742_v17 = vadd.f32 %v1078_v43, %v734_v15 }
 0x22d   : > { %771 = vst [vmem:[%s244_s17] sm:$0xff] %v767_v16  ;;  %v746_v18 = vsub.f32 0.0, %v742_v17 }
 0x22f   : > { %v1102_v19 = vpop.eup %1101  ;;  %v753_v20 = vmul.f32 1.442695, %v746_v18 }
 0x230   : > { %v1104_v21 = vpop.eup %1103  ;;  %v757_v22 = vadd.f32 1.0, %v1102_v19 }
 0x231   : > { %v764_v23 = vmul.f32 %v1104_v21, %v740_v55  ;;  %1105 = vpow2.f32 %v753_v20 }
 0x232   : > { %1107 = vrcp.f32 %v757_v22 }
 0x233   : > { %v768_v24 = vadd.f32 %v764_v23, %v1366_v9 }
 0x235   : > { %772 = vst [vmem:[%s244_s17 + $0x8] sm:$0xff] %v768_v24 }
 0x237   : > { %v1106_v25 = vpop.eup %1105 }
 0x238   : > { %v1108_v26 = vpop.eup %1107  ;;  %v758_v8 = vadd.f32 1.0, %v1106_v25 }
 0x239   : > { %v765_v27 = vmul.f32 %v1108_v26, %v741_v0 }
 0x23a   : > { %1109 = vrcp.f32 %v758_v8 }
 0x23b   : > { %v769_v28 = vadd.f32 %v765_v27, %v1370_v11 }
 0x23d   : > { %773 = vst [vmem:[%s244_s17 + $0x10] sm:$0xff] %v769_v28 }
 0x240   : > { %v1110_v29 = vpop.eup %1109 }
 0x241   : > { %v766_v9 = vmul.f32 %v1110_v29, %v742_v17 }
 0x243   : > { %v770_v30 = vadd.f32 %v766_v9, %v1372_v12 }
 0x245   : > { %774 = vst [vmem:[%s244_s17 + $0x18] sm:$0xff] %v770_v30 }
 0x246   : > { %1168 = shalt.err (!%p1165_p4)
}
 0x247   : > { %s1212_s12 = smov 128   ;;  %s1213_s16 = smov 8  }
 0x248   : > { %1028 = dma.vmem_to_hbm [thread:$0]  (%p1294_p11), %s789_s28, 512, %s791_s9, %s776_s29, %s1212_s12, %s1212_s12, %s1213_s16  }
 0x249 PF: > { %s805_s17 = sand.u32 1, %s1195_s18   ;;  %p1509_p7 = scmp.ge.s32.totalorder %s1207_s21, 2 }
 0x24a   : > { %s806_s26 = scalar_lea.sflag [#allocation4], %s805_s17 }
 0x24b   : > { %p1035_p5 = pnand %p1509_p7, %p1298_p12 }
 0x24d   : > { %p1036_p8 = pneg %p1035_p5 }
 0x24f   : > { %1190 = dma.done.wait (%p1036_p8), %s806_s26, 512  }
 0x250   : > { %1192 = vsyncadd (%p1036_p8), %s806_s26, 4294966784  ;;  %p18_p10 = scmp.ge.s32.totalorder %s1269_s24, 4   ;;  %s1510_s18 = smov %s1199_s19 }
 0x251   : > { %s1511_s19 = smov %s1203_s20  ;;  %s1512_s20 = smov %s1281_s27 }
 0x252   : > { %s1513_s21 = smov %s1269_s24  ;;  %20 = sbr.rel (!%p18_p10) target bundleno = 5 (0x5), region = 87 }
 0x257   :  { %812 = vsyncpa [#allocation3], 1 }
 0x258   :  { %814 = vsyncpa [#allocation3 + $0x1], 1 }
 0x259   :  { %815 = vsyncpa [#allocation4], 1 }
 0x25a   :  { %817 = vsyncpa [#allocation4 + $0x1], 1 }

</bundles_post_ra>
